<compile_context>
chip_gen: v7x
topology: tpu7x:2x2x1
jax: 0.10.0
libtpu: 0.0.40
codegen_flags: <defaults>
</compile_context>

<pallas_src>
import functools

import jax
import jax.numpy as jnp
import numpy as np
from jax.experimental import pallas as pl
from jax.experimental.pallas import tpu as pltpu

LN_EPS = 1e-5
SEG = 128   # lane-aligned column segment width inside the matrix slab
R = 8       # sublane replication of the single latent row (one natural (8,128) tile)


# ----------------------------------------------------------------------------
# Pallas kernel: entire LSRE_CANN forward on a single (replicated) latent row.
# ----------------------------------------------------------------------------
def _lsre_cann_kernel(mat_ref, vec_ref, out_ref, *, depth, L, F,
                      min_log_std, max_log_std):
    def layernorm(x, w, b):
        mean = jnp.mean(x, axis=-1, keepdims=True)
        var = jnp.mean((x - mean) ** 2, axis=-1, keepdims=True)
        return (x - mean) * jax.lax.rsqrt(var + LN_EPS) * w + b

    # Latent parameter, replicated across 8 sublanes (all rows identical -> the
    # final row 0 is the per-asset result; see degeneracy note above).
    z = jnp.broadcast_to(vec_ref[0:1, :L], (R, L)).astype(jnp.float32)

    # ---- LSRE self-attention stack (softmax over a single key == 1, wv@wo fused
    # host-side).  depth is small, keep the Python unroll (static slab indices).
    for d in range(depth):
        w_attn = mat_ref[d, :L, 0:L]                       # fused wv @ wo  (L, L)
        w1 = mat_ref[d, :L, SEG:SEG + F]                   # (L, F)
        w2 = mat_ref[d, :F, 2 * SEG:2 * SEG + L]           # (F, L)
        r = 1 + 7 * d
        bo = vec_ref[r + 0:r + 1, :L]
        ln1w = vec_ref[r + 1:r + 2, :L]
        ln1b = vec_ref[r + 2:r + 3, :L]
        b1 = vec_ref[r + 3:r + 4, :F]
        b2 = vec_ref[r + 4:r + 5, :L]
        ln2w = vec_ref[r + 5:r + 6, :L]
        ln2b = vec_ref[r + 6:r + 7, :L]

        attn_out = jnp.dot(z, w_attn, preferred_element_type=jnp.float32) + bo
        z = layernorm(z + attn_out, ln1w, ln1b)
        h1 = jnp.maximum(
            jnp.dot(z, w1, preferred_element_type=jnp.float32) + b1, 0.0)
        ff = jnp.dot(h1, w2, preferred_element_type=jnp.float32) + b2
        z = layernorm(z + ff, ln2w, ln2b)

    # ---- CANN: all asset rows of z are identical, so the asset-softmax is uniform
    # over identical value rows and h == v_linear(z); q/k projections are dead.
    wv_c = mat_ref[depth, :L, 0:L]                         # (L, L)
    w_out = mat_ref[depth, :L, SEG:2 * SEG]                # (L, 128), cols 0:2 real
    rb = 1 + 7 * depth
    bv_c = vec_ref[rb:rb + 1, :L]
    b_out = vec_ref[rb + 1:rb + 2, 0:SEG]                  # (1, 128), lanes 0:2 real

    h = jnp.dot(z, wv_c, preferred_element_type=jnp.float32) + bv_c

    # ---- Output head, lane-dense (128 columns; only 0 = mu, 1 = log_std are real).
    logits = jnp.dot(h, w_out, preferred_element_type=jnp.float32) + b_out  # (R, 128)
    std_all = jnp.exp(jnp.clip(logits, min_log_std, max_log_std))
    col = jax.lax.broadcasted_iota(jnp.int32, logits.shape, 1)
    out_ref[...] = jnp.where(col == 0, logits, std_all).astype(out_ref.dtype)


# ----------------------------------------------------------------------------
# Host-side operand packing: 2 slabs instead of ~31 individual tiny operands.
# ----------------------------------------------------------------------------
def _pad_row(v, width):
    v = v.astype(jnp.float32)
    return jnp.pad(v, ((0, 0), (0, width - v.shape[1])))


def _pack_params(params):
    z = params["z"]                       # (1, L)
    L = z.shape[1]
    depth = len(params["self"])
    F = params["self"][0]["w1"].shape[1] if depth else L
    out_dim = params["out_w"].shape[1]
    assert L <= SEG and F <= SEG and out_dim <= SEG
    Lp = max(L, F)

    layers = []
    vec_rows = [_pad_row(z, SEG)]
    for p in params["self"]:
        m = jnp.zeros((Lp, 3 * SEG), jnp.float32)
        m = m.at[:L, 0:L].set(p["wv"] @ p["wo"])           # host-fused attention weight
        m = m.at[:L, SEG:SEG + F].set(p["w1"])
        m = m.at[:F, 2 * SEG:2 * SEG + L].set(p["w2"])
        layers.append(m)
        for key in ("bo", "ln1w", "ln1b", "b1", "b2", "ln2w", "ln2b"):
            vec_rows.append(_pad_row(p[key], SEG))

    tail = jnp.zeros((Lp, 3 * SEG), jnp.float32)
    tail = tail.at[:L, 0:L].set(params["cann"]["wv"])
    tail = tail.at[:L, SEG:SEG + out_dim].set(params["out_w"])
    layers.append(tail)
    vec_rows.append(_pad_row(params["cann"]["bv"], SEG))
    vec_rows.append(_pad_row(params["out_b"], SEG))

    mat_slab = jnp.stack(layers, axis=0)                   # (depth+1, Lp, 3*SEG)
    vec_slab = jnp.concatenate(vec_rows, axis=0)           # (3 + 7*depth, SEG)
    return mat_slab, vec_slab, L, F, depth


# ----------------------------------------------------------------------------
# Python wrapper: one fused, gridless pallas_call; broadcast result over assets.
# ----------------------------------------------------------------------------
def lsre_cann_forward(x, params, cfg):
    """x: (asset_dim, window_size, feat_dim) -> (mu, std), each (asset_dim, 1)."""
    assert cfg["num_latents"] == 1, "LSRE_CANN requires num_latents == 1 (z.squeeze(1))"
    B = x.shape[0]
    # NOTE: faithful to the PyTorch module, the cross-attention output is assigned
    # to `x` and never consumed, so (mu, std) do not depend on x / cross weights and
    # are identical for every asset row; the kernel computes one row, the wrapper
    # broadcasts.  x is only used for its leading dimension.
    mat_slab, vec_slab, L, F, depth = _pack_params(params)

    kernel = functools.partial(
        _lsre_cann_kernel,
        depth=depth, L=L, F=F,
        min_log_std=float(cfg["min_log_std"]),
        max_log_std=float(cfg["max_log_std"]),
    )

    flops = 2 * R * (depth * (L * L + L * F + F * L) + L * L + L * SEG)
    bytes_accessed = (mat_slab.size + vec_slab.size + R * SEG) * 4
    out = pl.pallas_call(
        kernel,
        out_shape=jax.ShapeDtypeStruct((R, SEG), jnp.float32),
        cost_estimate=pl.CostEstimate(
            flops=int(flops),
            transcendentals=int(R * SEG + 4 * depth * R),
            bytes_accessed=int(bytes_accessed),
        ),
        compiler_params=pltpu.CompilerParams(vmem_limit_bytes=16 * 1024 * 1024),
    )(mat_slab, vec_slab)

    mu = jnp.broadcast_to(out[0:1, 0:1], (B, 1))
    std = jnp.broadcast_to(out[0:1, 1:2], (B, 1))
    return mu, std


# ----------------------------------------------------------------------------
# Deterministic synthetic parameters mirroring the nn.Module shapes.
# ----------------------------------------------------------------------------
def _init_linear(key, din, dout, bias=True):
    kw, kb = jax.random.split(key)
    bound = 1.0 / float(np.sqrt(din))
    w = jax.random.uniform(kw, (din, dout), jnp.float32, -bound, bound)
    b = jax.random.uniform(kb, (1, dout), jnp.float32, -bound, bound) if bias else None
    return w, b


def _init_attention_block(key, num_heads, head_dim, q_dim, kv_dim):
    inner = num_heads * head_dim
    ff_inner = int(2 ** int(np.ceil(np.log2(q_dim))))
    ks = jax.random.split(key, 8)
    wq, _ = _init_linear(ks[0], q_dim, inner, bias=False)
    wk, _ = _init_linear(ks[1], kv_dim, inner, bias=False)
    wv, _ = _init_linear(ks[2], kv_dim, inner, bias=False)
    wo, bo = _init_linear(ks[3], inner, q_dim)
    w1, b1 = _init_linear(ks[4], q_dim, ff_inner)
    w2, b2 = _init_linear(ks[5], ff_inner, q_dim)
    return {
        "wq": wq, "wk": wk, "wv": wv, "wo": wo, "bo": bo,
        "ln1w": 1.0 + 0.01 * jax.random.normal(ks[6], (1, q_dim), jnp.float32),
        "ln1b": 0.01 * jax.random.normal(ks[7], (1, q_dim), jnp.float32),
        "w1": w1, "b1": b1, "w2": w2, "b2": b2,
        "ln2w": jnp.ones((1, q_dim), jnp.float32),
        "ln2b": jnp.zeros((1, q_dim), jnp.float32),
    }


def init_lsre_cann(key, cfg):
    L, F, depth = cfg["latent_dim"], cfg["feat_dim"], cfg["depth"]
    keys = jax.random.split(key, 4 + depth)
    params = {
        "z": jax.random.normal(keys[0], (cfg["num_latents"], L), jnp.float32),
        "cross": _init_attention_block(
            keys[1], cfg["num_cross_heads"], cfg["cross_head_dim"], L, F),
        "self": [
            _init_attention_block(
                keys[2 + i], cfg["num_latent_heads"], cfg["latent_head_dim"], L, L)
            for i in range(depth)
        ],
    }
    kq, kk, kv = jax.random.split(keys[2 + depth], 3)
    wq, bq = _init_linear(kq, L, L)
    wk, bk = _init_linear(kk, L, L)
    wv, bv = _init_linear(kv, L, L)
    params["cann"] = {"wq": wq, "bq": bq, "wk": wk, "bk": bk, "wv": wv, "bv": bv}
    params["out_w"], params["out_b"] = _init_linear(keys[3 + depth], L, 2)
    return params


# ----------------------------------------------------------------------------
# Pure-JAX reference executing the FULL module math (incl. discarded cross block,
# per-head projections, both softmaxes) for correctness checking.
# ----------------------------------------------------------------------------
def _ref_layernorm(x, w, b):
    mean = jnp.mean(x, axis=-1, keepdims=True)
    var = jnp.mean((x - mean) ** 2, axis=-1, keepdims=True)
    return (x - mean) * jax.lax.rsqrt(var + LN_EPS) * w + b


def _ref_attention(q, kv, p, num_heads, head_dim):
    B, N, _ = q.shape
    S = kv.shape[1]
    scale = float(head_dim) ** -0.5
    Q = (q @ p["wq"]).reshape(B, N, num_heads, head_dim).transpose(0, 2, 1, 3)
    K = (kv @ p["wk"]).reshape(B, S, num_heads, head_dim).transpose(0, 2, 1, 3)
    V = (kv @ p["wv"]).reshape(B, S, num_heads, head_dim).transpose(0, 2, 1, 3)
    scores = jnp.einsum("bhnd,bhsd->bhns", Q, K) * scale
    attn = jax.nn.softmax(scores, axis=-1)
    o = jnp.einsum("bhns,bhsd->bhnd", attn, V)
    o = o.transpose(0, 2, 1, 3).reshape(B, N, num_heads * head_dim)
    return o @ p["wo"] + p["bo"][0]


def _ref_attention_block(q, kv, p, num_heads, head_dim):
    z = _ref_layernorm(q + _ref_attention(q, kv, p, num_heads, head_dim),
                       p["ln1w"][0], p["ln1b"][0])
    h1 = jax.nn.relu(z @ p["w1"] + p["b1"][0])
    ff = h1 @ p["w2"] + p["b2"][0]
    return _ref_layernorm(z + ff, p["ln2w"][0], p["ln2b"][0])


def _ref_lsre_cann(x, params, cfg):
    B = x.shape[0]
    z = jnp.broadcast_to(params["z"][None], (B,) + params["z"].shape)
    _ = _ref_attention_block(z, x, params["cross"],
                             cfg["num_cross_heads"], cfg["cross_head_dim"])  # discarded
    for p in params["self"]:
        z = _ref_attention_block(z, z, p,
                                 cfg["num_latent_heads"], cfg["latent_head_dim"])
    z = jnp.squeeze(z, axis=1)
    c = params["cann"]
    q = z @ c["wq"] + c["bq"][0]
    k = z @ c["wk"] + c["bk"][0]
    v = z @ c["wv"] + c["bv"][0]
    scores = q @ k.T * (float(cfg["latent_dim"]) ** -0.5)
    attn = jax.nn.softmax(scores, axis=-1)
    h = attn @ v
    logits = h @ params["out_w"] + params["out_b"][0]
    mu, log_std = logits[:, 0:1], logits[:, 1:2]
    std = jnp.exp(jnp.clip(log_std, cfg["min_log_std"], cfg["max_log_std"]))
    return mu, std


# ----------------------------------------------------------------------------
if __name__ == "__main__":
    cfg = {
        "depth": 2,
        "feat_dim": 8,
        "num_latents": 1,
        "latent_dim": 32,
        "num_cross_heads": 2,
        "cross_head_dim": 16,
        "num_latent_heads": 2,
        "latent_head_dim": 16,
        "min_log_std": -5.0,
        "max_log_std": 2.0,
    }
    asset_dim, window_size = 4, 16

    key = jax.random.PRNGKey(0)
    k_x, k_p = jax.random.split(key)
    x = jax.random.normal(k_x, (asset_dim, window_size, cfg["feat_dim"]), jnp.float32)
    params = init_lsre_cann(k_p, cfg)

    mu, std = lsre_cann_forward(x, params, cfg)
    mu = jax.block_until_ready(mu)
    std = jax.block_until_ready(std)

    assert mu.shape == (asset_dim, 1), mu.shape
    assert std.shape == (asset_dim, 1), std.shape

    mu_ref, std_ref = _ref_lsre_cann(x, params, cfg)
    mu_ref = jax.block_until_ready(mu_ref)
    std_ref = jax.block_until_ready(std_ref)

    if not np.allclose(np.asarray(mu), np.asarray(mu_ref), rtol=1e-3, atol=1e-3):
        raise AssertionError("Pallas LSRE_CANN mu does not match JAX reference")
    if not np.allclose(np.asarray(std), np.asarray(std_ref), rtol=1e-3, atol=1e-3):
        raise AssertionError("Pallas LSRE_CANN std does not match JAX reference")

    print("KERNEL_OK")
</pallas_src>

<mosaic_0001>
module attributes {stable_mosaic.version = 11 : i64} {
  func.func @_lsre_cann_kernel(%arg0: memref<3x32x384xf32, #tpu.memory_space<vmem>>, %arg1: memref<17x128xf32, #tpu.memory_space<vmem>>, %arg2: memref<8x128xf32, #tpu.memory_space<vmem>>) attributes {dimension_semantics = [], scalar_prefetch = 0 : i64, scratch_operands = 0 : i64, tpu.core_type = #tpu.core_type<tc>} {
    %c0 = arith.constant 0 : index
    %c0_0 = arith.constant 0 : index
    %0 = vector.load %arg1[%c0, %c0_0] : memref<17x128xf32, #tpu.memory_space<vmem>>, vector<1x32xf32>
    %1 = vector.shape_cast %0 : vector<1x32xf32> to vector<1x32xf32>
    %2 = vector.broadcast %1 : vector<1x32xf32> to vector<8x32xf32>
    %c0_1 = arith.constant 0 : index
    %c0_2 = arith.constant 0 : index
    %c0_3 = arith.constant 0 : index
    %3 = vector.load %arg0[%c0_1, %c0_2, %c0_3] : memref<3x32x384xf32, #tpu.memory_space<vmem>>, vector<1x32x32xf32>
    %4 = vector.shape_cast %3 : vector<1x32x32xf32> to vector<32x32xf32>
    %c0_4 = arith.constant 0 : index
    %c0_5 = arith.constant 0 : index
    %c128 = arith.constant 128 : index
    %5 = vector.load %arg0[%c0_4, %c0_5, %c128] : memref<3x32x384xf32, #tpu.memory_space<vmem>>, vector<1x32x32xf32>
    %6 = vector.shape_cast %5 : vector<1x32x32xf32> to vector<32x32xf32>
    %c0_6 = arith.constant 0 : index
    %c0_7 = arith.constant 0 : index
    %c256 = arith.constant 256 : index
    %7 = vector.load %arg0[%c0_6, %c0_7, %c256] : memref<3x32x384xf32, #tpu.memory_space<vmem>>, vector<1x32x32xf32>
    %8 = vector.shape_cast %7 : vector<1x32x32xf32> to vector<32x32xf32>
    %c1 = arith.constant 1 : index
    %c0_8 = arith.constant 0 : index
    %9 = vector.load %arg1[%c1, %c0_8] : memref<17x128xf32, #tpu.memory_space<vmem>>, vector<1x32xf32>
    %c2 = arith.constant 2 : index
    %c0_9 = arith.constant 0 : index
    %10 = vector.load %arg1[%c2, %c0_9] : memref<17x128xf32, #tpu.memory_space<vmem>>, vector<1x32xf32>
    %c3 = arith.constant 3 : index
    %c0_10 = arith.constant 0 : index
    %11 = vector.load %arg1[%c3, %c0_10] : memref<17x128xf32, #tpu.memory_space<vmem>>, vector<1x32xf32>
    %c4 = arith.constant 4 : index
    %c0_11 = arith.constant 0 : index
    %12 = vector.load %arg1[%c4, %c0_11] : memref<17x128xf32, #tpu.memory_space<vmem>>, vector<1x32xf32>
    %c5 = arith.constant 5 : index
    %c0_12 = arith.constant 0 : index
    %13 = vector.load %arg1[%c5, %c0_12] : memref<17x128xf32, #tpu.memory_space<vmem>>, vector<1x32xf32>
    %c6 = arith.constant 6 : index
    %c0_13 = arith.constant 0 : index
    %14 = vector.load %arg1[%c6, %c0_13] : memref<17x128xf32, #tpu.memory_space<vmem>>, vector<1x32xf32>
    %c7 = arith.constant 7 : index
    %c0_14 = arith.constant 0 : index
    %15 = vector.load %arg1[%c7, %c0_14] : memref<17x128xf32, #tpu.memory_space<vmem>>, vector<1x32xf32>
    %cst = arith.constant dense<0.000000e+00> : vector<8x32xf32>
    %16 = tpu.matmul %2, %4, %cst {dimension_numbers = #tpu.dot_dimension_numbers<[1], [0], [0], [1], [0, 0, 1, 1], [], []>} : vector<8x32xf32>, vector<32x32xf32>, vector<8x32xf32> -> vector<8x32xf32>
    %17 = vector.broadcast %9 : vector<1x32xf32> to vector<8x32xf32>
    %18 = arith.addf %16, %17 : vector<8x32xf32>
    %19 = arith.addf %2, %18 : vector<8x32xf32>
    %cst_15 = arith.constant dense<0.000000e+00> : vector<8xf32>
    %20 = vector.multi_reduction <add>, %19, %cst_15 [1] : vector<8x32xf32> to vector<8xf32>
    %21 = vector.shape_cast %20 : vector<8xf32> to vector<8x1xf32>
    %cst_16 = arith.constant 3.200000e+01 : f32
    %22 = vector.broadcast %cst_16 : f32 to vector<8x1xf32>
    %23 = arith.divf %21, %22 : vector<8x1xf32>
    %24 = vector.broadcast %23 : vector<8x1xf32> to vector<8x32xf32>
    %25 = arith.subf %19, %24 : vector<8x32xf32>
    %26 = arith.mulf %25, %25 : vector<8x32xf32>
    %cst_17 = arith.constant dense<0.000000e+00> : vector<8xf32>
    %27 = vector.multi_reduction <add>, %26, %cst_17 [1] : vector<8x32xf32> to vector<8xf32>
    %28 = vector.shape_cast %27 : vector<8xf32> to vector<8x1xf32>
    %cst_18 = arith.constant 3.200000e+01 : f32
    %29 = vector.broadcast %cst_18 : f32 to vector<8x1xf32>
    %30 = arith.divf %28, %29 : vector<8x1xf32>
    %31 = vector.broadcast %23 : vector<8x1xf32> to vector<8x32xf32>
    %32 = arith.subf %19, %31 : vector<8x32xf32>
    %cst_19 = arith.constant 9.99999974E-6 : f32
    %33 = vector.broadcast %cst_19 : f32 to vector<8x1xf32>
    %34 = arith.addf %30, %33 : vector<8x1xf32>
    %35 = math.rsqrt %34 : vector<8x1xf32>
    %36 = vector.broadcast %35 : vector<8x1xf32> to vector<8x32xf32>
    %37 = arith.mulf %32, %36 : vector<8x32xf32>
    %38 = vector.broadcast %10 : vector<1x32xf32> to vector<8x32xf32>
    %39 = arith.mulf %37, %38 : vector<8x32xf32>
    %40 = vector.broadcast %11 : vector<1x32xf32> to vector<8x32xf32>
    %41 = arith.addf %39, %40 : vector<8x32xf32>
    %cst_20 = arith.constant dense<0.000000e+00> : vector<8x32xf32>
    %42 = tpu.matmul %41, %6, %cst_20 {dimension_numbers = #tpu.dot_dimension_numbers<[1], [0], [0], [1], [0, 0, 1, 1], [], []>} : vector<8x32xf32>, vector<32x32xf32>, vector<8x32xf32> -> vector<8x32xf32>
    %43 = vector.broadcast %12 : vector<1x32xf32> to vector<8x32xf32>
    %44 = arith.addf %42, %43 : vector<8x32xf32>
    %cst_21 = arith.constant 0.000000e+00 : f32
    %45 = vector.broadcast %cst_21 : f32 to vector<8x32xf32>
    %46 = arith.maximumf %44, %45 : vector<8x32xf32>
    %cst_22 = arith.constant dense<0.000000e+00> : vector<8x32xf32>
    %47 = tpu.matmul %46, %8, %cst_22 {dimension_numbers = #tpu.dot_dimension_numbers<[1], [0], [0], [1], [0, 0, 1, 1], [], []>} : vector<8x32xf32>, vector<32x32xf32>, vector<8x32xf32> -> vector<8x32xf32>
    %48 = vector.broadcast %13 : vector<1x32xf32> to vector<8x32xf32>
    %49 = arith.addf %47, %48 : vector<8x32xf32>
    %50 = arith.addf %41, %49 : vector<8x32xf32>
    %cst_23 = arith.constant dense<0.000000e+00> : vector<8xf32>
    %51 = vector.multi_reduction <add>, %50, %cst_23 [1] : vector<8x32xf32> to vector<8xf32>
    %52 = vector.shape_cast %51 : vector<8xf32> to vector<8x1xf32>
    %cst_24 = arith.constant 3.200000e+01 : f32
    %53 = vector.broadcast %cst_24 : f32 to vector<8x1xf32>
    %54 = arith.divf %52, %53 : vector<8x1xf32>
    %55 = vector.broadcast %54 : vector<8x1xf32> to vector<8x32xf32>
    %56 = arith.subf %50, %55 : vector<8x32xf32>
    %57 = arith.mulf %56, %56 : vector<8x32xf32>
    %cst_25 = arith.constant dense<0.000000e+00> : vector<8xf32>
    %58 = vector.multi_reduction <add>, %57, %cst_25 [1] : vector<8x32xf32> to vector<8xf32>
    %59 = vector.shape_cast %58 : vector<8xf32> to vector<8x1xf32>
    %cst_26 = arith.constant 3.200000e+01 : f32
    %60 = vector.broadcast %cst_26 : f32 to vector<8x1xf32>
    %61 = arith.divf %59, %60 : vector<8x1xf32>
    %62 = vector.broadcast %54 : vector<8x1xf32> to vector<8x32xf32>
    %63 = arith.subf %50, %62 : vector<8x32xf32>
    %cst_27 = arith.constant 9.99999974E-6 : f32
    %64 = vector.broadcast %cst_27 : f32 to vector<8x1xf32>
    %65 = arith.addf %61, %64 : vector<8x1xf32>
    %66 = math.rsqrt %65 : vector<8x1xf32>
    %67 = vector.broadcast %66 : vector<8x1xf32> to vector<8x32xf32>
    %68 = arith.mulf %63, %67 : vector<8x32xf32>
    %69 = vector.broadcast %14 : vector<1x32xf32> to vector<8x32xf32>
    %70 = arith.mulf %68, %69 : vector<8x32xf32>
    %71 = vector.broadcast %15 : vector<1x32xf32> to vector<8x32xf32>
    %72 = arith.addf %70, %71 : vector<8x32xf32>
    %c1_28 = arith.constant 1 : index
    %c0_29 = arith.constant 0 : index
    %c0_30 = arith.constant 0 : index
    %73 = vector.load %arg0[%c1_28, %c0_29, %c0_30] : memref<3x32x384xf32, #tpu.memory_space<vmem>>, vector<1x32x32xf32>
    %74 = vector.shape_cast %73 : vector<1x32x32xf32> to vector<32x32xf32>
    %c1_31 = arith.constant 1 : index
    %c0_32 = arith.constant 0 : index
    %c128_33 = arith.constant 128 : index
    %75 = vector.load %arg0[%c1_31, %c0_32, %c128_33] : memref<3x32x384xf32, #tpu.memory_space<vmem>>, vector<1x32x32xf32>
    %76 = vector.shape_cast %75 : vector<1x32x32xf32> to vector<32x32xf32>
    %c1_34 = arith.constant 1 : index
    %c0_35 = arith.constant 0 : index
    %c256_36 = arith.constant 256 : index
    %77 = vector.load %arg0[%c1_34, %c0_35, %c256_36] : memref<3x32x384xf32, #tpu.memory_space<vmem>>, vector<1x32x32xf32>
    %78 = vector.shape_cast %77 : vector<1x32x32xf32> to vector<32x32xf32>
    %c8 = arith.constant 8 : index
    %c0_37 = arith.constant 0 : index
    %79 = vector.load %arg1[%c8, %c0_37] : memref<17x128xf32, #tpu.memory_space<vmem>>, vector<1x32xf32>
    %c9 = arith.constant 9 : index
    %c0_38 = arith.constant 0 : index
    %80 = vector.load %arg1[%c9, %c0_38] : memref<17x128xf32, #tpu.memory_space<vmem>>, vector<1x32xf32>
    %c10 = arith.constant 10 : index
    %c0_39 = arith.constant 0 : index
    %81 = vector.load %arg1[%c10, %c0_39] : memref<17x128xf32, #tpu.memory_space<vmem>>, vector<1x32xf32>
    %c11 = arith.constant 11 : index
    %c0_40 = arith.constant 0 : index
    %82 = vector.load %arg1[%c11, %c0_40] : memref<17x128xf32, #tpu.memory_space<vmem>>, vector<1x32xf32>
    %c12 = arith.constant 12 : index
    %c0_41 = arith.constant 0 : index
    %83 = vector.load %arg1[%c12, %c0_41] : memref<17x128xf32, #tpu.memory_space<vmem>>, vector<1x32xf32>
    %c13 = arith.constant 13 : index
    %c0_42 = arith.constant 0 : index
    %84 = vector.load %arg1[%c13, %c0_42] : memref<17x128xf32, #tpu.memory_space<vmem>>, vector<1x32xf32>
    %c14 = arith.constant 14 : index
    %c0_43 = arith.constant 0 : index
    %85 = vector.load %arg1[%c14, %c0_43] : memref<17x128xf32, #tpu.memory_space<vmem>>, vector<1x32xf32>
    %cst_44 = arith.constant dense<0.000000e+00> : vector<8x32xf32>
    %86 = tpu.matmul %72, %74, %cst_44 {dimension_numbers = #tpu.dot_dimension_numbers<[1], [0], [0], [1], [0, 0, 1, 1], [], []>} : vector<8x32xf32>, vector<32x32xf32>, vector<8x32xf32> -> vector<8x32xf32>
    %87 = vector.broadcast %79 : vector<1x32xf32> to vector<8x32xf32>
    %88 = arith.addf %86, %87 : vector<8x32xf32>
    %89 = arith.addf %72, %88 : vector<8x32xf32>
    %cst_45 = arith.constant dense<0.000000e+00> : vector<8xf32>
    %90 = vector.multi_reduction <add>, %89, %cst_45 [1] : vector<8x32xf32> to vector<8xf32>
    %91 = vector.shape_cast %90 : vector<8xf32> to vector<8x1xf32>
    %cst_46 = arith.constant 3.200000e+01 : f32
    %92 = vector.broadcast %cst_46 : f32 to vector<8x1xf32>
    %93 = arith.divf %91, %92 : vector<8x1xf32>
    %94 = vector.broadcast %93 : vector<8x1xf32> to vector<8x32xf32>
    %95 = arith.subf %89, %94 : vector<8x32xf32>
    %96 = arith.mulf %95, %95 : vector<8x32xf32>
    %cst_47 = arith.constant dense<0.000000e+00> : vector<8xf32>
    %97 = vector.multi_reduction <add>, %96, %cst_47 [1] : vector<8x32xf32> to vector<8xf32>
    %98 = vector.shape_cast %97 : vector<8xf32> to vector<8x1xf32>
    %cst_48 = arith.constant 3.200000e+01 : f32
    %99 = vector.broadcast %cst_48 : f32 to vector<8x1xf32>
    %100 = arith.divf %98, %99 : vector<8x1xf32>
    %101 = vector.broadcast %93 : vector<8x1xf32> to vector<8x32xf32>
    %102 = arith.subf %89, %101 : vector<8x32xf32>
    %cst_49 = arith.constant 9.99999974E-6 : f32
    %103 = vector.broadcast %cst_49 : f32 to vector<8x1xf32>
    %104 = arith.addf %100, %103 : vector<8x1xf32>
    %105 = math.rsqrt %104 : vector<8x1xf32>
    %106 = vector.broadcast %105 : vector<8x1xf32> to vector<8x32xf32>
    %107 = arith.mulf %102, %106 : vector<8x32xf32>
    %108 = vector.broadcast %80 : vector<1x32xf32> to vector<8x32xf32>
    %109 = arith.mulf %107, %108 : vector<8x32xf32>
    %110 = vector.broadcast %81 : vector<1x32xf32> to vector<8x32xf32>
    %111 = arith.addf %109, %110 : vector<8x32xf32>
    %cst_50 = arith.constant dense<0.000000e+00> : vector<8x32xf32>
    %112 = tpu.matmul %111, %76, %cst_50 {dimension_numbers = #tpu.dot_dimension_numbers<[1], [0], [0], [1], [0, 0, 1, 1], [], []>} : vector<8x32xf32>, vector<32x32xf32>, vector<8x32xf32> -> vector<8x32xf32>
    %113 = vector.broadcast %82 : vector<1x32xf32> to vector<8x32xf32>
    %114 = arith.addf %112, %113 : vector<8x32xf32>
    %cst_51 = arith.constant 0.000000e+00 : f32
    %115 = vector.broadcast %cst_51 : f32 to vector<8x32xf32>
    %116 = arith.maximumf %114, %115 : vector<8x32xf32>
    %cst_52 = arith.constant dense<0.000000e+00> : vector<8x32xf32>
    %117 = tpu.matmul %116, %78, %cst_52 {dimension_numbers = #tpu.dot_dimension_numbers<[1], [0], [0], [1], [0, 0, 1, 1], [], []>} : vector<8x32xf32>, vector<32x32xf32>, vector<8x32xf32> -> vector<8x32xf32>
    %118 = vector.broadcast %83 : vector<1x32xf32> to vector<8x32xf32>
    %119 = arith.addf %117, %118 : vector<8x32xf32>
    %120 = arith.addf %111, %119 : vector<8x32xf32>
    %cst_53 = arith.constant dense<0.000000e+00> : vector<8xf32>
    %121 = vector.multi_reduction <add>, %120, %cst_53 [1] : vector<8x32xf32> to vector<8xf32>
    %122 = vector.shape_cast %121 : vector<8xf32> to vector<8x1xf32>
    %cst_54 = arith.constant 3.200000e+01 : f32
    %123 = vector.broadcast %cst_54 : f32 to vector<8x1xf32>
    %124 = arith.divf %122, %123 : vector<8x1xf32>
    %125 = vector.broadcast %124 : vector<8x1xf32> to vector<8x32xf32>
    %126 = arith.subf %120, %125 : vector<8x32xf32>
    %127 = arith.mulf %126, %126 : vector<8x32xf32>
    %cst_55 = arith.constant dense<0.000000e+00> : vector<8xf32>
    %128 = vector.multi_reduction <add>, %127, %cst_55 [1] : vector<8x32xf32> to vector<8xf32>
    %129 = vector.shape_cast %128 : vector<8xf32> to vector<8x1xf32>
    %cst_56 = arith.constant 3.200000e+01 : f32
    %130 = vector.broadcast %cst_56 : f32 to vector<8x1xf32>
    %131 = arith.divf %129, %130 : vector<8x1xf32>
    %132 = vector.broadcast %124 : vector<8x1xf32> to vector<8x32xf32>
    %133 = arith.subf %120, %132 : vector<8x32xf32>
    %cst_57 = arith.constant 9.99999974E-6 : f32
    %134 = vector.broadcast %cst_57 : f32 to vector<8x1xf32>
    %135 = arith.addf %131, %134 : vector<8x1xf32>
    %136 = math.rsqrt %135 : vector<8x1xf32>
    %137 = vector.broadcast %136 : vector<8x1xf32> to vector<8x32xf32>
    %138 = arith.mulf %133, %137 : vector<8x32xf32>
    %139 = vector.broadcast %84 : vector<1x32xf32> to vector<8x32xf32>
    %140 = arith.mulf %138, %139 : vector<8x32xf32>
    %141 = vector.broadcast %85 : vector<1x32xf32> to vector<8x32xf32>
    %142 = arith.addf %140, %141 : vector<8x32xf32>
    %c2_58 = arith.constant 2 : index
    %c0_59 = arith.constant 0 : index
    %c0_60 = arith.constant 0 : index
    %143 = vector.load %arg0[%c2_58, %c0_59, %c0_60] : memref<3x32x384xf32, #tpu.memory_space<vmem>>, vector<1x32x32xf32>
    %144 = vector.shape_cast %143 : vector<1x32x32xf32> to vector<32x32xf32>
    %c2_61 = arith.constant 2 : index
    %c0_62 = arith.constant 0 : index
    %c128_63 = arith.constant 128 : index
    %145 = vector.load %arg0[%c2_61, %c0_62, %c128_63] : memref<3x32x384xf32, #tpu.memory_space<vmem>>, vector<1x32x128xf32>
    %146 = vector.shape_cast %145 : vector<1x32x128xf32> to vector<32x128xf32>
    %c15 = arith.constant 15 : index
    %c0_64 = arith.constant 0 : index
    %147 = vector.load %arg1[%c15, %c0_64] : memref<17x128xf32, #tpu.memory_space<vmem>>, vector<1x32xf32>
    %c16 = arith.constant 16 : index
    %c0_65 = arith.constant 0 : index
    %148 = vector.load %arg1[%c16, %c0_65] : memref<17x128xf32, #tpu.memory_space<vmem>>, vector<1x128xf32>
    %cst_66 = arith.constant dense<0.000000e+00> : vector<8x32xf32>
    %149 = tpu.matmul %142, %144, %cst_66 {dimension_numbers = #tpu.dot_dimension_numbers<[1], [0], [0], [1], [0, 0, 1, 1], [], []>} : vector<8x32xf32>, vector<32x32xf32>, vector<8x32xf32> -> vector<8x32xf32>
    %150 = vector.broadcast %147 : vector<1x32xf32> to vector<8x32xf32>
    %151 = arith.addf %149, %150 : vector<8x32xf32>
    %cst_67 = arith.constant dense<0.000000e+00> : vector<8x128xf32>
    %152 = tpu.matmul %151, %146, %cst_67 {dimension_numbers = #tpu.dot_dimension_numbers<[1], [0], [0], [1], [0, 0, 1, 1], [], []>} : vector<8x32xf32>, vector<32x128xf32>, vector<8x128xf32> -> vector<8x128xf32>
    %153 = vector.broadcast %148 : vector<1x128xf32> to vector<8x128xf32>
    %154 = arith.addf %152, %153 : vector<8x128xf32>
    %cst_68 = arith.constant -5.000000e+00 : f32
    %cst_69 = arith.constant 2.000000e+00 : f32
    %155 = vector.broadcast %cst_68 : f32 to vector<8x128xf32>
    %156 = arith.maximumf %155, %154 : vector<8x128xf32>
    %157 = vector.broadcast %cst_69 : f32 to vector<8x128xf32>
    %158 = arith.minimumf %157, %156 : vector<8x128xf32>
    %159 = math.exp %158 : vector<8x128xf32>
    %160 = tpu.iota {dimensions = array<i32: 1>} : vector<8x128xi32>
    %c0_i32 = arith.constant 0 : i32
    %161 = vector.broadcast %c0_i32 : i32 to vector<8x128xi32>
    %162 = arith.cmpi eq, %160, %161 : vector<8x128xi32>
    %163 = arith.select %162, %154, %159 : vector<8x128xi1>, vector<8x128xf32>
    %c0_70 = arith.constant 0 : index
    %c0_71 = arith.constant 0 : index
    %164 = vector.load %arg2[%c0_70, %c0_71] : memref<8x128xf32, #tpu.memory_space<vmem>>, vector<8x128xf32>
    tpu.vector_store %arg2[%c0_70, %c0_71], %163 {strides = array<i32>} : memref<8x128xf32, #tpu.memory_space<vmem>>, vector<8x128xf32>,
    return
  }
}

</mosaic_0001>

<bundles_post_ra>
// kernel: tpu_custom_call.1
= control target key start
LH: loop header
LB: loop body
LE: loop exit
PB: predicated region body
PF: predicated region fallthrough
CT: control target
= control target key end

     0   :  { %7 = vsyncpa [#allocation3], 0  ;;  %s1238_s0 = inlined_call_operand.hbm [shape: f32[3,32,384], index: 0, kind: input, shape index: {}]   ;;  %s1239_s1 = inlined_call_operand.hbm [shape: f32[17,128], index: 1, kind: input, shape index: {}]   ;;  %s1240_s2 = inlined_call_operand.hbm [shape: f32[8,128], index: 2, kind: output, shape index: {}]  }
   0x1   :  { %8 = vsyncpa [#allocation6], 0 }
   0x2   :  { %9 = vsyncpa [#allocation4], 0  ;;  %s1129_s9 = smov [#allocation2]   ;;  %s1057_s13 = scalar_lea.hbm %s1238_s0, 4608 }
   0x3   :  { %s15_s10 = sshll.u32 %s1129_s9, 4  ;;  %p1058_p0 = scmp.ne.s32.totalorder %s1238_s0, %s1057_s13  ;;  %s16_s10 = int_to_ptr.vmem [resolvable:$true] %s15_s10 }
   0x4   :  { %p1061_p1 = scmp.lt.u32.totalorder %s1057_s13, %s1238_s0 }
   0x6   :  { %p1063_p2 = pnand %p1061_p1, %p1058_p0 }
   0x8   :  { %1066 = shalt.err (!%p1063_p2)
}
   0x9   :  { %s1067_s18 = scalar_lea.vmem %s16_s10, 4608  ;;  %p1072_p4 = scmp.lt.s32.totalorder %s16_s10, %s16_s10 }
   0xa   :  { %p1068_p3 = scmp.ne.s32.totalorder %s16_s10, %s1067_s18  ;;  %p1073_p5 = scmp.lt.s32.totalorder %s1067_s18, %s1067_s18 }
   0xc   :  { %p1074_p6 = por %p1073_p5, %p1072_p4 }
   0xe   :  { %p1075_p7 = pnand %p1074_p6, %p1068_p3 }
  0x10   :  { %1078 = shalt.err (!%p1075_p7)
}
  0x11   :  { %s1130_s19 = smov 384   ;;  %s1131_s20 = smov 24  }
  0x12   :  { %21 = dma.hbm_to_vmem [thread:$0]  %s1238_s0, 4608, %s16_s10, [#allocation3], %s1130_s19, %s1130_s19, %s1131_s20  }
  0x13   :  { %s1132_s23 = smov [#allocation5]   ;;  %s1079_s27 = scalar_lea.hbm %s1239_s1, 384 }
  0x14   :  { %s27_s24 = sshll.u32 %s1132_s23, 4  ;;  %p1080_p8 = scmp.ne.s32.totalorder %s1239_s1, %s1079_s27  ;;  %s28_s24 = int_to_ptr.vmem [resolvable:$true] %s27_s24 }
  0x15   :  { %p1083_p9 = scmp.lt.u32.totalorder %s1079_s27, %s1239_s1 }
  0x17   :  { %p1085_p10 = pnand %p1083_p9, %p1080_p8 }
  0x19   :  { %1088 = shalt.err (!%p1085_p10)
}
  0x1a   :  { %s1089_s4 = scalar_lea.vmem %s28_s24, 384  ;;  %p1094_p12 = scmp.lt.s32.totalorder %s28_s24, %s28_s24 }
  0x1b   :  { %p1090_p11 = scmp.ne.s32.totalorder %s28_s24, %s1089_s4  ;;  %p1095_p13 = scmp.lt.s32.totalorder %s1089_s4, %s1089_s4 }
  0x1d   :  { %p1096_p0 = por %p1095_p13, %p1094_p12 }
  0x1f   :  { %p1097_p1 = pnand %p1096_p0, %p1090_p11 }
  0x21   :  { %1100 = shalt.err (!%p1097_p1)
}
  0x22   :  { %s1133_s0 = smov 128   ;;  %s1134_s5 = smov 8  }
  0x23   :  { %33 = dma.hbm_to_vmem [thread:$0]  %s1239_s1, 384, %s28_s24, [#allocation6], %s1133_s0, %s1133_s0, %s1134_s5  }
  0x24   :  { %1123 = dma.done.wait [#allocation3], 4608  }
  0x25   :  { %1124 = vsyncadd [#allocation3], 4294962688 }
  0x26   :  { %1125 = dma.done.wait [#allocation6], 384  }
  0x27   :  { %1126 = vsyncadd [#allocation6], 4294966912  ;;  %v1135_v0 = vmov 0.0|0.0   ;;  %vm1136_vm0 = vmmov 0   ;;  %v1137_v1 = vmov 0.0   ;;  %v45_v2 = vld [vmem:[#allocation2] sm:$0xff] }
  0x28   :  { %989 = vmatprep.subr.bf16.mxu0 %v1135_v0  ;;  %909 = vmatprep.mubr.msk.f32.mxu0 %vm1136_vm0, %v1137_v1  ;;  %v46_v3 = vld [vmem:[#allocation2 + $0x18] sm:$0xff]  ;;  %v47_v4 = vld [vmem:[#allocation2 + $0x30] sm:$0xff]  ;;  %v48_v6 = vld [vmem:[#allocation2 + $0x48] sm:$0xff]  ;;  %vm68_vm1 = vcmask 261120   ;;  %s1138_s1 = smov [#allocation7]  }
  0x29   :  { %995 = vmatprep.subr.bf16.mxu1 %v1135_v0  ;;  %920 = vmatprep.mubr.msk.f32.mxu1 %vm1136_vm0, %v1137_v1  ;;  %v990_v5 = vpack.c.bf16 %v46_v3, %v45_v2  ;;  %v993_v7 = vpack.c.bf16 %v48_v6, %v47_v4  ;;  %v836_v8 = vld [vmem:[#allocation5] ss:$0 sm:$0xff]  ;;  %v837_v9 = vld [vmem:[#allocation5 + $0x1] ss:$0 sm:$0xff]  ;;  %v49_v20 = vld [vmem:[#allocation2 + $0x8] sm:$0xff]  ;;  %s826_s8 = sshll.u32 %s1138_s1, 4  ;;  %s827_s8 = int_to_ptr.vmem [resolvable:$true] %s826_s8 }
  0x2a   :  { %v50_v21 = vld [vmem:[#allocation2 + $0x20] sm:$0xff]  ;;  %v51_v22 = vld [vmem:[#allocation2 + $0x38] sm:$0xff]  ;;  %v52_v24 = vld [vmem:[#allocation2 + $0x50] sm:$0xff]  ;;  %s1101_s9 = scalar_lea.vmem %s827_s8, 128  ;;  %p1106_p3 = scmp.lt.s32.totalorder %s827_s8, %s827_s8 }
  0x2b   :  { %991 = vmatpush3.bf16.msra.mxu0 %v990_v5  ;;  %v996_v23 = vpack.c.bf16 %v50_v21, %v49_v20  ;;  %v999_v25 = vpack.c.bf16 %v52_v24, %v51_v22  ;;  %v53_v26 = vld [vmem:[#allocation2 + $0x10] sm:$0xff]  ;;  %v54_v27 = vld [vmem:[#allocation2 + $0x28] sm:$0xff]  ;;  %v839_v33 = vld [vmem:[#allocation5 + $0x2] ss:$0 sm:$0xff]  ;;  %p1102_p2 = scmp.ne.s32.totalorder %s827_s8, %s1101_s9  ;;  %p1107_p4 = scmp.lt.s32.totalorder %s1101_s9, %s1101_s9 }
  0x2c   :  { %992 = vmatprep.subr.bf16.mxu0 %v1135_v0  ;;  %v1002_v28 = vpack.c.bf16 %v54_v27, %v53_v26  ;;  %v840_v35 = vld [vmem:[#allocation5 + $0x3] ss:$0 sm:$0xff]  ;;  %v56_v39 = vld [vmem:[#allocation2 + $0x58] sm:$0xff]  ;;  %v841_v41 = vld [vmem:[#allocation5 + $0x4] ss:$0 sm:$0xff] }
  0x2d   :  { %997 = vmatpush3.bf16.msra.mxu1 %v996_v23  ;;  %v55_v38 = vld [vmem:[#allocation2 + $0x40] sm:$0xff]  ;;  %v348_v58 = vld [vmem:[#allocation2 + $0x78] sm:$0xff]  ;;  %v349_v60 = vld [vmem:[#allocation2 + $0x90] sm:$0xff]  ;;  %p1108_p5 = por %p1107_p4, %p1106_p3 }
  0x2e   :  { %998 = vmatprep.subr.bf16.mxu1 %v1135_v0  ;;  %v1005_v40 = vpack.c.bf16 %v56_v39, %v55_v38  ;;  %v843_v46 = vld [vmem:[#allocation5 + $0x5] ss:$0 sm:$0xff]  ;;  %v350_v61 = vld [vmem:[#allocation2 + $0xa8] sm:$0xff]  ;;  %v845_v5 = vld [vmem:[#allocation5 + $0x6] ss:$0 sm:$0xff] }
  0x2f   :  { %994 = vmatpush3.bf16.msra.mxu0 %v993_v7  ;;  %v347_v57 = vld [vmem:[#allocation2 + $0x60] sm:$0xff]  ;;  %v1011_v62 = vpack.c.bf16 %v350_v61, %v349_v60  ;;  %v351_v21 = vld [vmem:[#allocation2 + $0x68] sm:$0xff]  ;;  %v353_v24 = vld [vmem:[#allocation2 + $0x98] sm:$0xff]  ;;  %p1109_p6 = pnand %p1108_p5, %p1102_p2 }
  0x30   :  { %1001 = vmatprep.subr.bf16.mxu0 %v1135_v0  ;;  %v1008_v59 = vpack.c.bf16 %v348_v58, %v347_v57  ;;  %v846_v7 = vld [vmem:[#allocation5 + $0x7] ss:$0 sm:$0xff]  ;;  %v355_v27 = vld [vmem:[#allocation2 + $0x70] sm:$0xff]  ;;  %v650_v61 = vld [vmem:[#allocation2 + $0x108] sm:$0xff] }
  0x31   :  { %1000 = vmatpush3.bf16.msra.mxu1 %v999_v25  ;;  %v352_v22 = vld [vmem:[#allocation2 + $0x80] sm:$0xff]  ;;  %v354_v25 = vld [vmem:[#allocation2 + $0xb0] sm:$0xff] }
  0x32   :  { %910 = vmatmul.mubr.msk.f32.vlgmr.msra.gmra.mrb[0].mxu0 %vm68_vm1, %v836_v8  ;;  %1007 = vmatprep.subr.bf16.mxu1 %v1135_v0  ;;  %v1014_v23 = vpack.c.bf16 %v352_v22, %v351_v21  ;;  %v1017_v26 = vpack.c.bf16 %v354_v25, %v353_v24  ;;  %v357_v39 = vld [vmem:[#allocation2 + $0xa0] sm:$0xff] }
  0x33   :  { %931 = vmatprep.mubr.msk.f32.mxu0 %vm1136_vm0, %v1137_v1  ;;  %1003 = vmatpush3.bf16.msra.mxu0 %v1002_v28  ;;  %v356_v28 = vld [vmem:[#allocation2 + $0x88] sm:$0xff]  ;;  %v647_v58 = vld [vmem:[#allocation2 + $0xc0] sm:$0xff] }
  0x34   :  { %1004 = vmatprep.subr.bf16.mxu0 %v1135_v0 }
  0x37   :  { %1006 = vmatpush3.bf16.msra.mxu0 %v1005_v40  ;;  %v358_v40 = vld [vmem:[#allocation2 + $0xb8] sm:$0xff] }
  0x38   :  { %1013 = vmatprep.subr.bf16.mxu0 %v1135_v0 }
 0x105   :  { %v138_v10 = vpop.f32.mrb[0].mxu0 }
 0x106   :  { %v139_v11 = vadd.f32 %v837_v9, %v138_v10  ;;  %v911_v12 = vpop.f32.mrb[1].mxu0  ;;  %v847_v10 = vld [vmem:[#allocation5 + $0x8] ss:$0 sm:$0xff] }
 0x108   :  { %v142_v13 = vadd.f32 %v836_v8, %v139_v11 }
 0x10a   :  { %v143_v14 = vsel %vm68_vm1, %v142_v13, 0.0 }
 0x10b   :  { %144 = vadd.xlane.f32.xlu0 %v143_v14 }
 0x198   :  { %v145_v15 = vpop.xlane.xlu0 %144 }
 0x199   :  { %v147_v16 = vmul.f32 0.03125, %v145_v15 }
 0x19b   :  { %v148_v17 = vsub.f32 %v142_v13, %v147_v16 }
 0x19d   :  { %v149_v18 = vmul.f32 %v148_v17, %v148_v17 }
 0x19f   :  { %v150_v19 = vsel %vm68_vm1, %v149_v18, 0.0 }
 0x1a0   :  { %151 = vadd.xlane.f32.xlu0 %v150_v19 }
 0x22d   :  { %v152_v29 = vpop.xlane.xlu0 %151 }
 0x22e   :  { %v153_v30 = vmul.f32 0.03125, %v152_v29  ;;  %v1020_v29 = vpack.c.bf16 %v356_v28, %v355_v27 }
 0x230   :  { %v154_v31 = vadd.f32 1e-05, %v153_v30 }
 0x232   :  { %1047 = vrsqrt.f32 %v154_v31 }
 0x23c   :  { %v1048_v32 = vpop.eup %1047 }
 0x23d   :  { %v156_v34 = vmul.f32 %v1048_v32, %v148_v17 }
 0x23f   :  { %v161_v36 = vmul.f32 %v839_v33, %v156_v34  ;;  %v849_v34 = vld [vmem:[#allocation5 + $0x9] ss:$0 sm:$0xff] }
 0x241   :  { %v166_v37 = vadd.f32 %v840_v35, %v161_v36  ;;  %v850_v36 = vld [vmem:[#allocation5 + $0xa] ss:$0 sm:$0xff] }
 0x243   :  { %921 = vmatmul.mubr.msk.f32.vlgmr.msra.gmra.mrb[0].mxu1 %vm68_vm1, %v166_v37 }
 0x244   :  { %942 = vmatprep.mubr.msk.f32.mxu1 %vm1136_vm0, %v1137_v1  ;;  %1009 = vmatpush3.bf16.msra.mxu1 %v1008_v59  ;;  %v648_v59 = vld [vmem:[#allocation2 + $0xd8] sm:$0xff] }
 0x245   :  { %1010 = vmatprep.subr.bf16.mxu1 %v1135_v0  ;;  %v1026_v60 = vpack.c.bf16 %v648_v59, %v647_v58 }
 0x248   :  { %1012 = vmatpush3.bf16.msra.mxu1 %v1011_v62 }
 0x249   :  { %1019 = vmatprep.subr.bf16.mxu1 %v1135_v0 }
 0x316   :  { %v240_v42 = vpop.f32.mrb[0].mxu1 }
 0x317   :  { %v241_v43 = vadd.f32 %v841_v41, %v240_v42  ;;  %v922_v44 = vpop.f32.mrb[1].mxu1  ;;  %v1023_v41 = vpack.c.bf16 %v358_v40, %v357_v39  ;;  %v851_v42 = vld [vmem:[#allocation5 + $0xb] ss:$0 sm:$0xff] }
 0x319   :  { %v244_v45 = vmax.f32 %v241_v43, 0.0 }
 0x31b   :  { %932 = vmatmul.mubr.msk.f32.vlgmr.msra.gmra.mrb[2].mxu0 %vm68_vm1, %v244_v45 }
 0x31c   :  { %953 = vmatprep.mubr.msk.f32.mxu0 %vm1136_vm0, %v1137_v1  ;;  %1015 = vmatpush3.bf16.msra.mxu0 %v1014_v23 }
 0x31d   :  { %1016 = vmatprep.subr.bf16.mxu0 %v1135_v0 }
 0x320   :  { %1018 = vmatpush3.bf16.msra.mxu0 %v1017_v26  ;;  %v815_v26 = vlaneseq }
 0x321   :  { %1025 = vmatprep.subr.bf16.mxu0 %v1135_v0 }
 0x322   :  { %v816_v27 = vand.u32 127, %v815_v26 }
 0x324   :  { %vm817_vm2 = vcmp.eq.s32.totalorder %v816_v27, 0 }
 0x3ee   :  { %v318_v47 = vpop.f32.mrb[2].mxu0 }
 0x3ef   :  { %v319_v48 = vadd.f32 %v843_v46, %v318_v47  ;;  %v933_v49 = vpop.f32.mrb[3].mxu0  ;;  %v853_v47 = vld [vmem:[#allocation5 + $0xc] ss:$0 sm:$0xff] }
 0x3f1   :  { %v322_v50 = vadd.f32 %v319_v48, %v166_v37 }
 0x3f3   :  { %v323_v51 = vsel %vm68_vm1, %v322_v50, 0.0 }
 0x3f4   :  { %324 = vadd.xlane.f32.xlu1 %v323_v51 }
 0x481   :  { %v325_v52 = vpop.xlane.xlu1 %324 }
 0x482   :  { %v326_v53 = vmul.f32 0.03125, %v325_v52 }
 0x484   :  { %v327_v54 = vsub.f32 %v322_v50, %v326_v53 }
 0x486   :  { %v328_v55 = vmul.f32 %v327_v54, %v327_v54 }
 0x488   :  { %v329_v56 = vsel %vm68_vm1, %v328_v55, 0.0 }
 0x489   :  { %330 = vadd.xlane.f32.xlu1 %v329_v56 }
 0x516   :  { %v331_v63 = vpop.xlane.xlu1 %330 }
 0x517   :  { %v332_v2 = vmul.f32 0.03125, %v331_v63  ;;  %v651_v63 = vld [vmem:[#allocation2 + $0xc8] sm:$0xff] }
 0x519   :  { %v333_v3 = vadd.f32 1e-05, %v332_v2  ;;  %v652_v2 = vld [vmem:[#allocation2 + $0xe0] sm:$0xff] }
 0x51b   :  { %1049 = vrsqrt.f32 %v333_v3  ;;  %v1032_v3 = vpack.c.bf16 %v652_v2, %v651_v63 }
 0x525   :  { %v1050_v4 = vpop.eup %1049 }
 0x526   :  { %v335_v6 = vmul.f32 %v1050_v4, %v327_v54 }
 0x528   :  { %v340_v8 = vmul.f32 %v845_v5, %v335_v6 }
 0x52a   :  { %v345_v9 = vadd.f32 %v846_v7, %v340_v8  ;;  %v855_v8 = vld [vmem:[#allocation5 + $0xd] ss:$0 sm:$0xff] }
 0x52c   :  { %943 = vmatmul.mubr.msk.f32.vlgmr.msra.gmra.mrb[2].mxu1 %vm68_vm1, %v345_v9 }
 0x52d   :  { %964 = vmatprep.mubr.msk.f32.mxu1 %vm1136_vm0, %v1137_v1  ;;  %1021 = vmatpush3.bf16.msra.mxu1 %v1020_v29 }
 0x52e   :  { %1022 = vmatprep.subr.bf16.mxu1 %v1135_v0 }
 0x531   :  { %1024 = vmatpush3.bf16.msra.mxu1 %v1023_v41 }
 0x532   :  { %1031 = vmatprep.subr.bf16.mxu1 %v1135_v0 }
 0x5ff   :  { %v439_v11 = vpop.f32.mrb[2].mxu1 }
 0x600   :  { %v440_v12 = vadd.f32 %v847_v10, %v439_v11  ;;  %v944_v13 = vpop.f32.mrb[3].mxu1  ;;  %v856_v10 = vld [vmem:[#allocation5 + $0xe] ss:$0 sm:$0xff] }
 0x601   :  { %v653_v13 = vld [vmem:[#allocation2 + $0xf8] sm:$0xff] }
 0x602   :  { %v443_v14 = vadd.f32 %v440_v12, %v345_v9 }
 0x604   :  { %v444_v15 = vsel %vm68_vm1, %v443_v14, 0.0 }
 0x605   :  { %445 = vadd.xlane.f32.xlu0 %v444_v15 }
 0x692   :  { %v446_v16 = vpop.xlane.xlu0 %445 }
 0x693   :  { %v447_v17 = vmul.f32 0.03125, %v446_v16  ;;  %v857_v16 = vld [vmem:[#allocation5 + $0xf] ss:$0 sm:$0xff] }
 0x695   :  { %v448_v18 = vsub.f32 %v443_v14, %v447_v17  ;;  %v654_v14 = vld [vmem:[#allocation2 + $0x110] sm:$0xff] }
 0x696   :  { %v1035_v15 = vpack.c.bf16 %v654_v14, %v653_v13 }
 0x697   :  { %v449_v19 = vmul.f32 %v448_v18, %v448_v18 }
 0x699   :  { %v450_v20 = vsel %vm68_vm1, %v449_v19, 0.0  ;;  %v859_v19 = vld [vmem:[#allocation5 + $0x10] ss:$0 sm:$0xff] }
 0x69a   :  { %451 = vadd.xlane.f32.xlu1 %v450_v20 }
 0x727   :  { %v452_v30 = vpop.xlane.xlu1 %451 }
 0x728   :  { %v453_v31 = vmul.f32 0.03125, %v452_v30 }
 0x72a   :  { %v454_v32 = vadd.f32 1e-05, %v453_v31 }
 0x72c   :  { %1051 = vrsqrt.f32 %v454_v32 }
 0x736   :  { %v1052_v33 = vpop.eup %1051 }
 0x737   :  { %v456_v35 = vmul.f32 %v1052_v33, %v448_v18 }
 0x739   :  { %v461_v37 = vmul.f32 %v849_v34, %v456_v35 }
 0x73b   :  { %v466_v38 = vadd.f32 %v850_v36, %v461_v37 }
 0x73d   :  { %954 = vmatmul.mubr.msk.f32.vlgmr.msra.gmra.mrb[4].mxu0 %vm68_vm1, %v466_v38 }
 0x73e   :  { %975 = vmatprep.mubr.msk.f32.mxu0 %vm1136_vm0, %v1137_v1  ;;  %1027 = vmatpush3.bf16.msra.mxu0 %v1026_v60 }
 0x73f   :  { %1028 = vmatprep.subr.bf16.mxu0 %v1135_v0 }
 0x810   :  { %v540_v43 = vpop.f32.mrb[4].mxu0 }
 0x811   :  { %v541_v44 = vadd.f32 %v851_v42, %v540_v43  ;;  %v955_v45 = vpop.f32.mrb[5].mxu0 }
 0x813   :  { %v544_v46 = vmax.f32 %v541_v44, 0.0 }
 0x815   :  { %965 = vmatmul.mubr.msk.f32.vlgmr.msra.gmra.mrb[4].mxu1 %vm68_vm1, %v544_v46 }
 0x816   :  { %986 = vmatprep.mubr.msk.f32.mxu1 %vm1136_vm0, %v1137_v1  ;;  %v649_v1 = vld [vmem:[#allocation2 + $0xf0] sm:$0xff]  ;;  %1033 = vmatpush3.bf16.msra.mxu1 %v1032_v3 }
 0x817   :  { %v1029_v62 = vpack.c.bf16 %v650_v61, %v649_v1  ;;  %1034 = vmatprep.subr.bf16.mxu1 %v1135_v0 }
 0x819   :  { %1030 = vmatpush3.bf16.msra.mxu0 %v1029_v62 }
 0x81a   :  { %1036 = vmatpush3.bf16.msra.mxu1 %v1035_v15 }
 0x8e8   :  { %v618_v48 = vpop.f32.mrb[4].mxu1 }
 0x8e9   :  { %v619_v49 = vadd.f32 %v853_v47, %v618_v48  ;;  %v966_v50 = vpop.f32.mrb[5].mxu1 }
 0x8eb   :  { %v622_v51 = vadd.f32 %v619_v49, %v466_v38 }
 0x8ed   :  { %v623_v52 = vsel %vm68_vm1, %v622_v51, 0.0 }
 0x8ee   :  { %624 = vadd.xlane.f32.xlu0 %v623_v52 }
 0x97b   :  { %v625_v53 = vpop.xlane.xlu0 %624 }
 0x97c   :  { %v626_v54 = vmul.f32 0.03125, %v625_v53 }
 0x97e   :  { %v627_v55 = vsub.f32 %v622_v51, %v626_v54 }
 0x980   :  { %v628_v56 = vmul.f32 %v627_v55, %v627_v55 }
 0x982   :  { %v629_v57 = vsel %vm68_vm1, %v628_v56, 0.0 }
 0x983   :  { %630 = vadd.xlane.f32.xlu1 %v629_v57 }
 0xa10   :  { %v631_v4 = vpop.xlane.xlu1 %630 }
 0xa11   :  { %v632_v5 = vmul.f32 0.03125, %v631_v4 }
 0xa13   :  { %v633_v6 = vadd.f32 1e-05, %v632_v5 }
 0xa15   :  { %1053 = vrsqrt.f32 %v633_v6 }
 0xa1f   :  { %v1054_v7 = vpop.eup %1053 }
 0xa20   :  { %v635_v9 = vmul.f32 %v1054_v7, %v627_v55 }
 0xa22   :  { %v640_v11 = vmul.f32 %v855_v8, %v635_v9 }
 0xa24   :  { %v645_v12 = vadd.f32 %v856_v10, %v640_v11 }
 0xa26   :  { %976 = vmatmul.mubr.msk.f32.vlgmr.msra.gmra.mrb[6].mxu0 %vm68_vm1, %v645_v12 }
 0xaf9   :  { %v730_v17 = vpop.f32.mrb[6].mxu0 }
 0xafa   :  { %v731_v18 = vadd.f32 %v857_v16, %v730_v17  ;;  %v977_v0 = vpop.f32.mrb[7].mxu0 }
 0xafc   :  { %987 = vmatmul.mubr.msk.f32.vlgmr.msra.gmra.mrb[6].mxu1 %vm68_vm1, %v731_v18 }
 0xbcf   :  { %v807_v20 = vpop.f32.mrb[6].mxu1 }
 0xbd0   :  { %v808_v21 = vadd.f32 %v859_v19, %v807_v20  ;;  %v988_v22 = vpop.f32.mrb[7].mxu1 }
 0xbd2   :  { %v811_v23 = vmax.f32 %v808_v21, -5.0 }
 0xbd4   :  { %v812_v24 = vmin.f32 %v811_v23, 2.0 }
 0xbd6   :  { %v813_v25 = vmul.f32 1.442695, %v812_v24 }
 0xbd8   :  { %1055 = vpow2.f32 %v813_v25 }
 0xbe2   :  { %v1056_v28 = vpop.eup %1055 }
 0xbe3   :  { %v818_v29 = vsel %vm817_vm2, %v808_v21, %v1056_v28 }
 0xbe4   :  { %819 = vst [vmem:[#allocation7] sm:$0xff] %v818_v29 }
 0xbe5   :  { %1112 = shalt.err (!%p1109_p6)
}
 0xbe6   :  { %s1113_s12 = scalar_lea.hbm %s1240_s2, 128 }
 0xbe7   :  { %p1114_p7 = scmp.ne.s32.totalorder %s1240_s2, %s1113_s12  ;;  %p1117_p8 = scmp.lt.u32.totalorder %s1113_s12, %s1240_s2 }
 0xbe9   :  { %p1119_p9 = pnand %p1117_p8, %p1114_p7 }
 0xbeb   :  { %1122 = shalt.err (!%p1119_p9)
}
 0xbec   :  { %829 = dma.vmem_to_hbm [thread:$0]  %s827_s8, 128, %s1240_s2, [#allocation4]  }
 0xbed   :  { %1127 = dma.done.wait [#allocation4], 128  }
 0xbee   :  { %1128 = vsyncadd [#allocation4], 4294967168 }
 0xbef   :  { %833 = vsyncpa [#allocation3], 1 }
 0xbf0   :  { %834 = vsyncpa [#allocation6], 1 }
 0xbf1   :  { %835 = vsyncpa [#allocation4], 1 }

</bundles_post_ra>
